<compile_context>
chip_gen: v6e
topology: v6e:2x2x1
jax: 0.10.0
libtpu: 0.0.40
codegen_flags: <defaults>
</compile_context>

<pallas_src>
import functools

import jax
import jax.numpy as jnp
import numpy as np
from jax.experimental import pallas as pl
from jax.experimental.pallas import tpu as pltpu


def _interp_matrix(out_size: int, in_size: int) -> jnp.ndarray:
    """(out_size, in_size) bilinear weight matrix, align_corners=True semantics."""
    if out_size > 1:
        scale = (in_size - 1) / (out_size - 1)
    else:
        scale = 0.0
    idx = jnp.arange(out_size, dtype=jnp.float32)
    src = idx * jnp.float32(scale)
    i0 = jnp.clip(jnp.floor(src).astype(jnp.int32), 0, in_size - 1)
    i1 = jnp.minimum(i0 + 1, in_size - 1)
    frac = src - i0.astype(jnp.float32)
    cols = jnp.arange(in_size, dtype=jnp.int32)
    one_hot0 = (cols[None, :] == i0[:, None]).astype(jnp.float32)
    one_hot1 = (cols[None, :] == i1[:, None]).astype(jnp.float32)
    return (1.0 - frac)[:, None] * one_hot0 + frac[:, None] * one_hot1


def _bilinear_kernel(whb_ref, wwt_ref, x_ref, o_ref):
    # whb_ref: (B_TILE, H_out, H_in)   -- Wh broadcast over the batch tile
    # wwt_ref: (W_in, W_out)           -- Ww pre-transposed (no in-kernel .T)
    # x_ref  : (B_TILE, H_in, W_in)
    # o_ref  : (B_TILE, H_out, W_out)
    x = x_ref[...].astype(jnp.float32)
    b, h_in, w_in = x.shape
    w_out = wwt_ref.shape[1]

    # W-pass: fold batch into the matmul M dimension (one large 2D matmul).
    xw = jnp.dot(
        x.reshape(b * h_in, w_in),
        wwt_ref[...],
        preferred_element_type=jnp.float32,
    ).reshape(b, h_in, w_out)

    # H-pass: standard batched matmul (B, H_out, H_in) @ (B, H_in, W_out).
    out = jnp.einsum(
        'boh,bhw->bow', whb_ref[...], xw,
        preferred_element_type=jnp.float32,
    )
    o_ref[...] = out.astype(o_ref.dtype)


def _choose_b_tile(nc, h_in, w_in, h_out, w_out, x_itemsize):
    """Pick the plane-batch tile so double-buffered blocks + temps fit a
    conservative VMEM data budget (sized for v7x's 64 MiB physical VMEM)."""
    budget = 24 * 1024 * 1024  # data budget; vmem_limit is set to 48 MiB
    per_plane = (
        2 * h_in * w_in * x_itemsize       # x block, double-buffered
        + 2 * h_out * w_out * x_itemsize   # out block, double-buffered
        + 2 * h_out * h_in * 4             # broadcast Wh block, double-buffered
        + h_in * w_in * 4                  # f32 copy of x
        + h_in * w_out * 4                 # W-pass temporary
        + h_out * w_out * 4                # f32 result before cast
    )
    fixed = 2 * w_in * w_out * 4           # Ww^T block, double-buffered
    b = (budget - fixed) // max(per_plane, 1)
    return int(max(1, min(b, nc)))


@functools.partial(jax.jit, static_argnums=(1,))
def downsampling(x: jnp.ndarray, sz) -> jnp.ndarray:
    """Equivalent of Downsampling.forward(x, sz): bilinear resize, align_corners=True.

    x : (N, C, H_in, W_in); sz = (W_out, H_out), matching F.interpolate(size=(sz[1], sz[0])).
    """
    w_out, h_out = int(sz[0]), int(sz[1])
    n, c, h_in, w_in = x.shape
    nc = n * c

    wh = _interp_matrix(h_out, h_in)          # (H_out, H_in)
    wwt = _interp_matrix(w_out, w_in).T       # (W_in, W_out), pre-transposed

    b_tile = _choose_b_tile(nc, h_in, w_in, h_out, w_out,
                            jnp.dtype(x.dtype).itemsize)
    num_blocks = pl.cdiv(nc, b_tile)
    nc_pad = num_blocks * b_tile

    xr = x.reshape(nc, h_in, w_in)
    if nc_pad != nc:
        xr = jnp.pad(xr, ((0, nc_pad - nc), (0, 0), (0, 0)))

    # Broadcast Wh across the batch tile wrapper-side so the kernel's H-pass is
    # a plain batched matmul with no in-kernel broadcast or transpose.
    whb = jnp.broadcast_to(wh[None], (b_tile, h_out, h_in))

    out = pl.pallas_call(
        _bilinear_kernel,
        out_shape=jax.ShapeDtypeStruct((nc_pad, h_out, w_out), x.dtype),
        grid_spec=pltpu.PrefetchScalarGridSpec(
            num_scalar_prefetch=0,
            grid=(num_blocks,),
            in_specs=[
                pl.BlockSpec((b_tile, h_out, h_in), lambda b: (0, 0, 0)),
                pl.BlockSpec((w_in, w_out), lambda b: (0, 0)),
                pl.BlockSpec((b_tile, h_in, w_in), lambda b: (b, 0, 0)),
            ],
            out_specs=pl.BlockSpec((b_tile, h_out, w_out), lambda b: (b, 0, 0)),
        ),
        compiler_params=pltpu.CompilerParams(
            dimension_semantics=("parallel",),
            vmem_limit_bytes=48 * 1024 * 1024,
        ),
    )(whb, wwt, xr)

    if nc_pad != nc:
        out = out[:nc]
    return out.reshape(n, c, h_out, w_out)


def _reference_bilinear(x: np.ndarray, sz) -> np.ndarray:
    """Gather-based reference of F.interpolate(..., 'bilinear', align_corners=True)."""
    w_out, h_out = int(sz[0]), int(sz[1])
    n, c, h_in, w_in = x.shape

    def coords(out_size, in_size):
        scale = (in_size - 1) / (out_size - 1) if out_size > 1 else 0.0
        src = np.arange(out_size, dtype=np.float64) * scale
        i0 = np.clip(np.floor(src).astype(np.int64), 0, in_size - 1)
        i1 = np.minimum(i0 + 1, in_size - 1)
        f = src - i0
        return i0, i1, f

    r0, r1, fr = coords(h_out, h_in)
    c0, c1, fc = coords(w_out, w_in)
    xf = x.astype(np.float64)
    top = xf[:, :, r0][:, :, :, c0] * (1 - fc)[None, None, None, :] + \
          xf[:, :, r0][:, :, :, c1] * fc[None, None, None, :]
    bot = xf[:, :, r1][:, :, :, c0] * (1 - fc)[None, None, None, :] + \
          xf[:, :, r1][:, :, :, c1] * fc[None, None, None, :]
    out = top * (1 - fr)[None, None, :, None] + bot * fr[None, None, :, None]
    return out.astype(x.dtype)


if __name__ == "__main__":
    key = jax.random.PRNGKey(0)
    n, c, h_in, w_in = 2, 4, 16, 16
    x = jax.random.normal(key, (n, c, h_in, w_in), dtype=jnp.float32)
    sz = (8, 8)  # (W_out, H_out), as in the PyTorch module's `sz` argument

    out = downsampling(x, sz)
    out = jax.block_until_ready(out)

    ref = _reference_bilinear(np.asarray(x), sz)
    np.testing.assert_allclose(np.asarray(out), ref, rtol=1e-5, atol=1e-5)
    assert out.shape == (n, c, sz[1], sz[0])
    print("KERNEL_OK")
</pallas_src>

<mosaic_0001>
module attributes {stable_mosaic.version = 11 : i64} {
  func.func @_bilinear_kernel(%arg0: i32, %arg1: memref<8x8x16xf32, #tpu.memory_space<vmem>>, %arg2: memref<16x8xf32, #tpu.memory_space<vmem>>, %arg3: memref<8x16x16xf32, #tpu.memory_space<vmem>>, %arg4: memref<8x8x8xf32, #tpu.memory_space<vmem>>) attributes {dimension_semantics = [#tpu.dimension_semantics<parallel>], iteration_bounds = array<i64: 1>, scalar_prefetch = 0 : i64, scratch_operands = 0 : i64, tpu.core_type = #tpu.core_type<tc>, window_params = [{pipeline_mode = #tpu.pipeline_mode<synchronous>, transform_indices = @transform_0, window_bounds = array<i64: 8, 8, 16>}, {pipeline_mode = #tpu.pipeline_mode<synchronous>, transform_indices = @transform_1, window_bounds = array<i64: 16, 8>}, {transform_indices = @transform_2, window_bounds = array<i64: 8, 16, 16>}, {transform_indices = @transform_3, window_bounds = array<i64: 8, 8, 8>}]} {
    %c0 = arith.constant 0 : index
    %c0_0 = arith.constant 0 : index
    %c0_1 = arith.constant 0 : index
    %0 = vector.load %arg3[%c0, %c0_0, %c0_1] : memref<8x16x16xf32, #tpu.memory_space<vmem>>, vector<8x16x16xf32>
    %1 = vector.shape_cast %0 : vector<8x16x16xf32> to vector<128x16xf32>
    %c0_2 = arith.constant 0 : index
    %c0_3 = arith.constant 0 : index
    %2 = vector.load %arg2[%c0_2, %c0_3] : memref<16x8xf32, #tpu.memory_space<vmem>>, vector<16x8xf32>
    %cst = arith.constant dense<0.000000e+00> : vector<128x8xf32>
    %3 = tpu.matmul %1, %2, %cst {dimension_numbers = #tpu.dot_dimension_numbers<[1], [0], [0], [1], [0, 0, 1, 1], [], []>} : vector<128x16xf32>, vector<16x8xf32>, vector<128x8xf32> -> vector<128x8xf32>
    %4 = vector.shape_cast %3 : vector<128x8xf32> to vector<8x16x8xf32>
    %c0_4 = arith.constant 0 : index
    %c0_5 = arith.constant 0 : index
    %c0_6 = arith.constant 0 : index
    %5 = vector.load %arg1[%c0_4, %c0_5, %c0_6] : memref<8x8x16xf32, #tpu.memory_space<vmem>>, vector<8x8x16xf32>
    "tpu.trace_start"() <{level = 10 : i32, message = "boh,bhw->bow"}> : () -> ()
    %cst_7 = arith.constant dense<0.000000e+00> : vector<8x8x8xf32>
    %6 = tpu.matmul %5, %4, %cst_7 {dimension_numbers = #tpu.dot_dimension_numbers<[2], [1], [1], [2], [0, 0, 0, 1, 1, 2], [0], [0]>} : vector<8x8x16xf32>, vector<8x16x8xf32>, vector<8x8x8xf32> -> vector<8x8x8xf32>
    "tpu.trace_stop"() : () -> ()
    %c0_8 = arith.constant 0 : index
    %c0_9 = arith.constant 0 : index
    %c0_10 = arith.constant 0 : index
    %7 = vector.load %arg4[%c0_8, %c0_9, %c0_10] : memref<8x8x8xf32, #tpu.memory_space<vmem>>, vector<8x8x8xf32>
    tpu.vector_store %arg4[%c0_8, %c0_9, %c0_10], %6 {strides = array<i32>} : memref<8x8x8xf32, #tpu.memory_space<vmem>>, vector<8x8x8xf32>,
    return
  }
  func.func @transform_0(%arg0: i32) -> (i32, i32, i32) {
    %c0_i32 = arith.constant 0 : i32
    %c0_i32_0 = arith.constant 0 : i32
    %c0_i32_1 = arith.constant 0 : i32
    %c0_i32_2 = arith.constant 0 : i32
    return %c0_i32, %c0_i32_0, %c0_i32_1 : i32, i32, i32
  }
  func.func @transform_1(%arg0: i32) -> (i32, i32) {
    %c0_i32 = arith.constant 0 : i32
    %c0_i32_0 = arith.constant 0 : i32
    %c0_i32_1 = arith.constant 0 : i32
    return %c0_i32, %c0_i32_0 : i32, i32
  }
  func.func @transform_2(%arg0: i32) -> (i32, i32, i32) {
    %c0_i32 = arith.constant 0 : i32
    %c0_i32_0 = arith.constant 0 : i32
    %c0_i32_1 = arith.constant 0 : i32
    return %arg0, %c0_i32, %c0_i32_0 : i32, i32, i32
  }
  func.func @transform_3(%arg0: i32) -> (i32, i32, i32) {
    %c0_i32 = arith.constant 0 : i32
    %c0_i32_0 = arith.constant 0 : i32
    %c0_i32_1 = arith.constant 0 : i32
    return %arg0, %c0_i32, %c0_i32_0 : i32, i32, i32
  }
}

</mosaic_0001>

<bundles_post_ra>
// kernel: downsampling.1
= control target key start
LH: loop header
LB: loop body
LE: loop exit
PB: predicated region body
PF: predicated region fallthrough
CT: control target
= control target key end

     0   :  { %8 = vsyncpa [#allocation3], 0  ;;  %s1191_s0 = inlined_call_operand.vmem [shape: f32[8,8,16], index: 0, kind: input, shape index: {}]   ;;  %s1192_s1 = inlined_call_operand.vmem [shape: f32[16,8], index: 1, kind: input, shape index: {}]   ;;  %s1193_s2 = inlined_call_operand.hbm [shape: f32[8,16,16], index: 2, kind: input, shape index: {}]   ;;  %s1194_s3 = inlined_call_operand.hbm [shape: f32[8,8,8], index: 3, kind: output, shape index: {}]  }
   0x1   :  { %9 = vsyncpa [#allocation4], 0  ;;  %s1059_s12 = smov [#allocation2]  }
   0x2   :  { %s19_s13 = sshll.u32 %s1059_s12, 4  ;;  %s20_s13 = int_to_ptr.vmem [resolvable:$true] %s19_s13 }
   0x3   :  { %s1023_s14 = scalar_lea.vmem %s20_s13, 2048  ;;  %p1028_p1 = scmp.lt.s32.totalorder %s20_s13, %s20_s13 }
   0x4   :  { %p1024_p0 = scmp.ne.s32.totalorder %s20_s13, %s1023_s14  ;;  %p1029_p2 = scmp.lt.s32.totalorder %s1023_s14, %s1023_s14 }
   0x6   :  { %p1030_p3 = por %p1029_p2, %p1028_p1 }
   0x8   :  { %p1031_p4 = pnand %p1030_p3, %p1024_p0 }
   0xa   :  { %1034 = shalt.err (!%p1031_p4)
}
   0xb   :  { %s1060_s15 = smov 128   ;;  %s1061_s16 = smov 8  }
   0xc   :  { %25 = dma.hbm_to_vmem [thread:$0]  %s1193_s2, 2048, %s20_s13, [#allocation3], %s1060_s15, %s1060_s15, %s1061_s16  }
   0xd   :  { %1055 = dma.done.wait [#allocation3], 2048  }
   0xe   :  { %1056 = vsyncadd [#allocation3], 4294965248  ;;  %vm47_vm0 = vcmask 130048   ;;  %v46_v0 = vld [vmem:[%s1192_s1 + $0x8] sm:$0xff]  ;;  %v45_v1 = vld [vmem:[%s1192_s1] sm:$0xff]  ;;  %v1062_v18 = vmov 0.0  }
   0xf   :  { %v29_v2 = vld [vmem:[#allocation2] sm:$0xff]  ;;  %925 = vmatprep.subr.mxu0 %v46_v0  ;;  %v30_v3 = vld [vmem:[#allocation2 + $0x8] sm:$0xff]  ;;  %v31_v4 = vld [vmem:[#allocation2 + $0x10] sm:$0xff]  ;;  %953 = vmatprep.subr.mxu1 %v1062_v18  ;;  %vm1063_vm1 = vmmov 0   ;;  %vm833_vm2 = vcmask 64512  }
  0x10   :  { %929 = vmatprep.mubr.msk.f32.mxu0 %vm47_vm0, %v29_v2  ;;  %926 = vmatpush3.msra.mxu0 %v46_v0  ;;  %v32_v5 = vld [vmem:[#allocation2 + $0x18] sm:$0xff]  ;;  %v33_v6 = vld [vmem:[#allocation2 + $0x20] sm:$0xff]  ;;  %v34_v7 = vld [vmem:[#allocation2 + $0x28] sm:$0xff] }
  0x11   :  { %927 = vmatprep.subr.mxu0 %v45_v1  ;;  %v35_v8 = vld [vmem:[#allocation2 + $0x30] sm:$0xff]  ;;  %v36_v9 = vld [vmem:[#allocation2 + $0x38] sm:$0xff]  ;;  %v37_v10 = vld [vmem:[#allocation2 + $0x40] sm:$0xff]  ;;  %957 = vmatprep.mubr.msk.f32.mxu1 %vm1063_vm1, %v1062_v18 }
  0x12   :  { %928 = vmatpush3.msra.mxu0 %v45_v1  ;;  %v38_v11 = vld [vmem:[#allocation2 + $0x48] sm:$0xff]  ;;  %v39_v12 = vld [vmem:[#allocation2 + $0x50] sm:$0xff]  ;;  %v40_v13 = vld [vmem:[#allocation2 + $0x58] sm:$0xff] }
  0x13   :  { %930 = vmatmul.mubr.msk.f32.vlgmr.msra.gmra.mxu0 %vm47_vm0, %v30_v3  ;;  %v41_v14 = vld [vmem:[#allocation2 + $0x60] sm:$0xff]  ;;  %v42_v15 = vld [vmem:[#allocation2 + $0x68] sm:$0xff]  ;;  %v43_v16 = vld [vmem:[#allocation2 + $0x70] sm:$0xff] }
  0x14   :  { %932 = vmatprep.mubr.msk.f32.mxu0 %vm47_vm0, %v31_v4  ;;  %v44_v17 = vld [vmem:[#allocation2 + $0x78] sm:$0xff]  ;;  %v241_v20 = vld [vmem:[%s1191_s0] sm:$0xff]  ;;  %v242_v23 = vld [vmem:[%s1191_s0 + $0x8] sm:$0xff] }
  0x15   :  { %v243_v26 = vld [vmem:[%s1191_s0 + $0x10] sm:$0xff]  ;;  %v244_v29 = vld [vmem:[%s1191_s0 + $0x18] sm:$0xff]  ;;  %v245_v32 = vld [vmem:[%s1191_s0 + $0x20] sm:$0xff] }
  0x16   :  { %v246_v35 = vld [vmem:[%s1191_s0 + $0x28] sm:$0xff]  ;;  %v247_v38 = vld [vmem:[%s1191_s0 + $0x30] sm:$0xff]  ;;  %v248_v41 = vld [vmem:[%s1191_s0 + $0x38] sm:$0xff]  ;;  %s1064_s0 = smov [#allocation5]  }
  0x17   :  { %933 = vmatmul.mubr.msk.f32.gmra.mxu0 %vm47_vm0, %v32_v5  ;;  %s847_s10 = sshll.u32 %s1064_s0, 4  ;;  %s848_s10 = int_to_ptr.vmem [resolvable:$true] %s847_s10 }
  0x18   :  { %935 = vmatprep.mubr.msk.f32.mxu0 %vm47_vm0, %v33_v6  ;;  %s1035_s11 = scalar_lea.vmem %s848_s10, 1024  ;;  %p1040_p6 = scmp.lt.s32.totalorder %s848_s10, %s848_s10 }
  0x19   :  { %p1036_p5 = scmp.ne.s32.totalorder %s848_s10, %s1035_s11  ;;  %p1041_p7 = scmp.lt.s32.totalorder %s1035_s11, %s1035_s11 }
  0x1b   :  { %936 = vmatmul.mubr.msk.f32.gmra.mxu0 %vm47_vm0, %v34_v7  ;;  %p1042_p8 = por %p1041_p7, %p1040_p6 }
  0x1c   :  { %938 = vmatprep.mubr.msk.f32.mxu0 %vm47_vm0, %v35_v8 }
  0x1d   :  { %p1043_p9 = pnand %p1042_p8, %p1036_p5 }
  0x1f   :  { %939 = vmatmul.mubr.msk.f32.gmra.mxu0 %vm47_vm0, %v36_v9 }
  0x20   :  { %941 = vmatprep.mubr.msk.f32.mxu0 %vm47_vm0, %v37_v10 }
  0x23   :  { %942 = vmatmul.mubr.msk.f32.gmra.mxu0 %vm47_vm0, %v38_v11 }
  0x24   :  { %944 = vmatprep.mubr.msk.f32.mxu0 %vm47_vm0, %v39_v12 }
  0x27   :  { %945 = vmatmul.mubr.msk.f32.gmra.mxu0 %vm47_vm0, %v40_v13 }
  0x28   :  { %947 = vmatprep.mubr.msk.f32.mxu0 %vm47_vm0, %v41_v14 }
  0x2b   :  { %948 = vmatmul.mubr.msk.f32.gmra.mxu0 %vm47_vm0, %v42_v15 }
  0x2c   :  { %950 = vmatprep.mubr.msk.f32.mxu0 %vm47_vm0, %v43_v16 }
  0x2f   :  { %951 = vmatmul.mubr.msk.f32.gmra.mxu0 %vm47_vm0, %v44_v17 }
  0xd3   :  { %v931_v19 = vpop.f32.mrf.mxu0 }
  0xd4   :  { %954 = vmatpush3.msra.mxu1 %v931_v19 }
  0xd5   :  { %v162_v21 = vpop.f32.mrf.mxu0  ;;  %955 = vmatprep.subr.mxu1 %v1062_v18 }
  0xd6   :  { %956 = vmatpush3.msra.mxu1 %v162_v21 }
  0xd7   :  { %v934_v22 = vpop.f32.mrf.mxu0  ;;  %958 = vmatmul.mubr.msk.f32.vlgmr.msra.gmra.mxu1 %vm47_vm0, %v241_v20  ;;  %960 = vmatprep.subr.mxu1 %v1062_v18 }
  0xd8   :  { %961 = vmatpush3.msra.mxu1 %v934_v22  ;;  %964 = vmatprep.mubr.msk.f32.mxu1 %vm1063_vm1, %v1062_v18 }
  0xd9   :  { %v172_v24 = vpop.f32.mrf.mxu0  ;;  %962 = vmatprep.subr.mxu1 %v1062_v18 }
  0xda   :  { %963 = vmatpush3.msra.mxu1 %v172_v24 }
  0xdb   :  { %v937_v25 = vpop.f32.mrf.mxu0  ;;  %965 = vmatmul.mubr.msk.f32.vlgmr.msra.gmra.mxu1 %vm47_vm0, %v242_v23  ;;  %967 = vmatprep.subr.mxu1 %v1062_v18 }
  0xdc   :  { %968 = vmatpush3.msra.mxu1 %v937_v25  ;;  %971 = vmatprep.mubr.msk.f32.mxu1 %vm1063_vm1, %v1062_v18 }
  0xdd   :  { %v182_v27 = vpop.f32.mrf.mxu0  ;;  %969 = vmatprep.subr.mxu1 %v1062_v18 }
  0xde   :  { %970 = vmatpush3.msra.mxu1 %v182_v27 }
  0xdf   :  { %v940_v28 = vpop.f32.mrf.mxu0  ;;  %972 = vmatmul.mubr.msk.f32.vlgmr.msra.gmra.mxu1 %vm47_vm0, %v243_v26  ;;  %974 = vmatprep.subr.mxu1 %v1062_v18 }
  0xe0   :  { %975 = vmatpush3.msra.mxu1 %v940_v28  ;;  %978 = vmatprep.mubr.msk.f32.mxu1 %vm1063_vm1, %v1062_v18 }
  0xe1   :  { %v192_v30 = vpop.f32.mrf.mxu0  ;;  %976 = vmatprep.subr.mxu1 %v1062_v18 }
  0xe2   :  { %977 = vmatpush3.msra.mxu1 %v192_v30 }
  0xe3   :  { %v943_v31 = vpop.f32.mrf.mxu0  ;;  %979 = vmatmul.mubr.msk.f32.vlgmr.msra.gmra.mxu1 %vm47_vm0, %v244_v29  ;;  %981 = vmatprep.subr.mxu1 %v1062_v18 }
  0xe4   :  { %982 = vmatpush3.msra.mxu1 %v943_v31  ;;  %985 = vmatprep.mubr.msk.f32.mxu1 %vm1063_vm1, %v1062_v18 }
  0xe5   :  { %v202_v33 = vpop.f32.mrf.mxu0  ;;  %983 = vmatprep.subr.mxu1 %v1062_v18 }
  0xe6   :  { %984 = vmatpush3.msra.mxu1 %v202_v33 }
  0xe7   :  { %v946_v34 = vpop.f32.mrf.mxu0  ;;  %986 = vmatmul.mubr.msk.f32.vlgmr.msra.gmra.mxu1 %vm47_vm0, %v245_v32  ;;  %988 = vmatprep.subr.mxu1 %v1062_v18 }
  0xe8   :  { %989 = vmatpush3.msra.mxu1 %v946_v34  ;;  %992 = vmatprep.mubr.msk.f32.mxu1 %vm1063_vm1, %v1062_v18 }
  0xe9   :  { %v212_v36 = vpop.f32.mrf.mxu0  ;;  %990 = vmatprep.subr.mxu1 %v1062_v18 }
  0xea   :  { %991 = vmatpush3.msra.mxu1 %v212_v36 }
  0xeb   :  { %v949_v37 = vpop.f32.mrf.mxu0  ;;  %993 = vmatmul.mubr.msk.f32.vlgmr.msra.gmra.mxu1 %vm47_vm0, %v246_v35  ;;  %995 = vmatprep.subr.mxu1 %v1062_v18 }
  0xec   :  { %996 = vmatpush3.msra.mxu1 %v949_v37  ;;  %999 = vmatprep.mubr.msk.f32.mxu1 %vm1063_vm1, %v1062_v18 }
  0xed   :  { %v222_v39 = vpop.f32.mrf.mxu0  ;;  %997 = vmatprep.subr.mxu1 %v1062_v18 }
  0xee   :  { %998 = vmatpush3.msra.mxu1 %v222_v39 }
  0xef   :  { %v952_v40 = vpop.f32.mrf.mxu0  ;;  %1000 = vmatmul.mubr.msk.f32.vlgmr.msra.gmra.mxu1 %vm47_vm0, %v247_v38  ;;  %1002 = vmatprep.subr.mxu1 %v1062_v18 }
  0xf0   :  { %1003 = vmatpush3.msra.mxu1 %v952_v40  ;;  %1006 = vmatprep.mubr.msk.f32.mxu1 %vm1063_vm1, %v1062_v18 }
  0xf1   :  { %v232_v42 = vpop.f32.mrf.mxu0  ;;  %1004 = vmatprep.subr.mxu1 %v1062_v18 }
  0xf2   :  { %1005 = vmatpush3.msra.mxu1 %v232_v42 }
  0xf3   :  { %1007 = vmatmul.mubr.msk.f32.vlgmr.msra.gmra.mxu1 %vm47_vm0, %v248_v41 }
 0x197   :  { %v318_v43 = vpop.f32.mrf.mxu1 }
 0x198   :  { %834 = vst.msk [vmem:[#allocation5] sm:$0xff] %vm833_vm2, %v318_v43 }
 0x199   :  { %v959_v44 = vpop.f32.mrf.mxu1 }
 0x19b   :  { %v391_v45 = vpop.f32.mrf.mxu1 }
 0x19c   :  { %835 = vst.msk [vmem:[#allocation5 + $0x8] sm:$0xff] %vm833_vm2, %v391_v45 }
 0x19d   :  { %v966_v46 = vpop.f32.mrf.mxu1 }
 0x19f   :  { %v464_v47 = vpop.f32.mrf.mxu1 }
 0x1a0   :  { %836 = vst.msk [vmem:[#allocation5 + $0x10] sm:$0xff] %vm833_vm2, %v464_v47 }
 0x1a1   :  { %v973_v48 = vpop.f32.mrf.mxu1 }
 0x1a3   :  { %v537_v49 = vpop.f32.mrf.mxu1 }
 0x1a4   :  { %837 = vst.msk [vmem:[#allocation5 + $0x18] sm:$0xff] %vm833_vm2, %v537_v49 }
 0x1a5   :  { %v980_v50 = vpop.f32.mrf.mxu1 }
 0x1a7   :  { %v610_v51 = vpop.f32.mrf.mxu1 }
 0x1a8   :  { %838 = vst.msk [vmem:[#allocation5 + $0x20] sm:$0xff] %vm833_vm2, %v610_v51 }
 0x1a9   :  { %v987_v52 = vpop.f32.mrf.mxu1 }
 0x1ab   :  { %v683_v53 = vpop.f32.mrf.mxu1 }
 0x1ac   :  { %839 = vst.msk [vmem:[#allocation5 + $0x28] sm:$0xff] %vm833_vm2, %v683_v53 }
 0x1ad   :  { %v994_v54 = vpop.f32.mrf.mxu1 }
 0x1af   :  { %v756_v55 = vpop.f32.mrf.mxu1 }
 0x1b0   :  { %840 = vst.msk [vmem:[#allocation5 + $0x30] sm:$0xff] %vm833_vm2, %v756_v55 }
 0x1b1   :  { %v1001_v56 = vpop.f32.mrf.mxu1 }
 0x1b3   :  { %v829_v57 = vpop.f32.mrf.mxu1 }
 0x1b4   :  { %841 = vst.msk [vmem:[#allocation5 + $0x38] sm:$0xff] %vm833_vm2, %v829_v57 }
 0x1b5   :  { %v1008_v58 = vpop.f32.mrf.mxu1 }
 0x1b6   :  { %1046 = shalt.err (!%p1043_p9)
}
 0x1b7   :  { %853 = dma.vmem_to_hbm [thread:$0]  %s848_s10, 1024, %s1194_s3, [#allocation4], %s1060_s15, %s1060_s15, %s1061_s16  }
 0x1b8   :  { %1057 = dma.done.wait [#allocation4], 1024  }
 0x1b9   :  { %1058 = vsyncadd [#allocation4], 4294966272 }
 0x1ba   :  { %857 = vsyncpa [#allocation3], 1 }
 0x1bb   :  { %858 = vsyncpa [#allocation4], 1 }

</bundles_post_ra>
